<compile_context>
chip_gen: v5e
topology: v5e:2x2
jax: 0.10.0
libtpu: 0.0.40
codegen_flags: <defaults>
</compile_context>

<pallas_src>
import functools

import jax
import jax.numpy as jnp
from jax.experimental import pallas as pl
from jax.experimental.pallas import tpu as pltpu


def _gru_recurrent_kernel(gi_ref, whh_ref, bhhn_ref, out_ref, h_ref):
    # gi_ref  : (T, BP, 3H)  precomputed x @ W_ih^T + b_ih (+ b_hh for r/z), f32
    # whh_ref : (H, 3H)      W_hh^T, resident in VMEM across the whole grid
    # bhhn_ref: (1, H)       b_hh for the n-gate (f32), resident
    # out_ref : (T, BP, H)   per-timestep hidden states for this chunk
    # h_ref   : (BP, H)      VMEM scratch carrying the hidden state across grid steps
    c = pl.program_id(0)

    @pl.when(c == 0)
    def _():
        h_ref[...] = jnp.zeros_like(h_ref)  # torch.nn.GRU default h0 = zeros

    whh = whh_ref[...]            # loaded once per grid step (resident weight)
    bhh_n = bhhn_ref[...]         # (1, H)
    T = gi_ref.shape[0]
    H = h_ref.shape[-1]

    def step(t, h):
        gi = gi_ref[t]                                             # (BP, 3H) f32
        gh = jnp.dot(h.astype(whh.dtype), whh,
                     preferred_element_type=jnp.float32)           # (BP, 3H) f32 accum
        r = jax.nn.sigmoid(gi[:, 0 * H:1 * H] + gh[:, 0 * H:1 * H])
        z = jax.nn.sigmoid(gi[:, 1 * H:2 * H] + gh[:, 1 * H:2 * H])
        n = jnp.tanh(gi[:, 2 * H:3 * H] + r * (gh[:, 2 * H:3 * H] + bhh_n))
        h_new = n + z * (h - n)                                    # == (1-z)*n + z*h
        out_ref[t] = h_new
        return h_new

    # Short, fixed trip count -> fully unroll so the LLO scheduler can overlap the
    # per-step matmul, EUP (sigmoid/tanh) and VPU gate math across timesteps.
    h_ref[...] = jax.lax.fori_loop(0, T, step, h_ref[...], unroll=True)


@functools.partial(jax.jit, static_argnames=("t_block", "use_bf16"))
def gru_forward(x, w_ih, w_hh, b_ih, b_hh, *, t_block=8, use_bf16=False):
    """x: (S, B, I); w_ih: (3H, I); w_hh: (3H, H); b_ih/b_hh: (3H,).

    Returns (output (S, B, H), hn (1, B, H)) matching torch.nn.GRU(batch_first=False)
    with h0 = zeros.
    """
    S, B, I = x.shape
    H = w_hh.shape[1]

    compute_dtype = jnp.bfloat16 if use_bf16 else jnp.float32

    # Padded sizes: batch -> multiple of 8 sublanes, sequence -> multiple of t_block.
    BP = ((B + 7) // 8) * 8
    n_chunks = (S + t_block - 1) // t_block
    SP = n_chunks * t_block

    # ---- Hoisted input projection: one big (S*B, I) @ (I, 3H) matmul (XLA) ----
    x2 = x.reshape(S * B, I).astype(compute_dtype)
    wih_t = jnp.transpose(w_ih).astype(compute_dtype)              # (I, 3H)
    gi = jnp.dot(x2, wih_t, preferred_element_type=jnp.float32)
    # Fold b_ih fully and the r/z parts of b_hh into gi (exact for those gates).
    bias_folded = b_ih.astype(jnp.float32) + jnp.concatenate(
        [b_hh[:2 * H].astype(jnp.float32), jnp.zeros((H,), jnp.float32)])
    gi = gi + bias_folded[None, :]                                  # (S*B, 3H) f32
    gi = gi.reshape(S, B, 3 * H)
    if (SP != S) or (BP != B):
        gi = jnp.pad(gi, ((0, SP - S), (0, BP - B), (0, 0)))        # (SP, BP, 3H)

    whh_t = jnp.transpose(w_hh).astype(compute_dtype)               # (H, 3H)
    bhh_n = b_hh[2 * H:].reshape(1, H).astype(jnp.float32)          # n-gate bias only

    # ---- Recurrent Pallas kernel: grid over sequence chunks (serial) ----
    out_p = pl.pallas_call(
        _gru_recurrent_kernel,
        out_shape=jax.ShapeDtypeStruct((SP, BP, H), jnp.float32),
        grid_spec=pltpu.PrefetchScalarGridSpec(
            num_scalar_prefetch=0,
            grid=(n_chunks,),
            in_specs=[
                pl.BlockSpec((t_block, BP, 3 * H), lambda c: (c, 0, 0)),  # gi chunk (pipelined)
                pl.BlockSpec((H, 3 * H), lambda c: (0, 0)),               # W_hh^T (resident)
                pl.BlockSpec((1, H), lambda c: (0, 0)),                   # b_hh_n (resident)
            ],
            out_specs=pl.BlockSpec((t_block, BP, H), lambda c: (c, 0, 0)),
            scratch_shapes=[pltpu.VMEM((BP, H), jnp.float32)],            # hidden-state carry
        ),
        compiler_params=pltpu.CompilerParams(
            dimension_semantics=("arbitrary",),   # time recurrence is inherently serial
        ),
    )(gi, whh_t, bhh_n)

    out = out_p[:S, :B, :]          # drop sequence/batch padding
    hn = out[S - 1][None]           # (1, B, H) -- no per-step hn store in the kernel
    return out, hn


def _reference_gru(x, w_ih, w_hh, b_ih, b_hh):
    """Pure-JAX reference matching torch.nn.GRU semantics (h0 = zeros)."""
    S, B, I = x.shape
    H = w_hh.shape[1]
    h = jnp.zeros((B, H), jnp.float32)
    outs = []
    for t in range(S):
        gi = x[t] @ w_ih.T + b_ih
        gh = h @ w_hh.T + b_hh
        r = jax.nn.sigmoid(gi[:, :H] + gh[:, :H])
        z = jax.nn.sigmoid(gi[:, H:2 * H] + gh[:, H:2 * H])
        n = jnp.tanh(gi[:, 2 * H:] + r * gh[:, 2 * H:])
        h = (1.0 - z) * n + z * h
        outs.append(h)
    return jnp.stack(outs, 0), h[None]


if __name__ == "__main__":
    # Small shapes consistent with the module: seq=8, batch=4, input_size=16, hidden=32
    S, B, I, H = 8, 4, 16, 32
    key = jax.random.PRNGKey(0)
    kx, k1, k2, k3, k4 = jax.random.split(key, 5)

    x = jax.random.normal(kx, (S, B, I), jnp.float32)

    # Deterministic init mimicking PyTorch: U(-1/sqrt(H), 1/sqrt(H))
    bound = 1.0 / (H ** 0.5)
    w_ih = jax.random.uniform(k1, (3 * H, I), jnp.float32, -bound, bound)
    w_hh = jax.random.uniform(k2, (3 * H, H), jnp.float32, -bound, bound)
    b_ih = jax.random.uniform(k3, (3 * H,), jnp.float32, -bound, bound)
    b_hh = jax.random.uniform(k4, (3 * H,), jnp.float32, -bound, bound)

    ref_out, ref_hn = _reference_gru(x, w_ih, w_hh, b_ih, b_hh)

    # f32 matmul path: exact (to f32 rounding) against the reference.
    out, hn = gru_forward(x, w_ih, w_hh, b_ih, b_hh, use_bf16=False)
    jax.block_until_ready((out, hn))
    assert out.shape == (S, B, H) and hn.shape == (1, B, H)
    assert jnp.allclose(out, ref_out, atol=1e-5, rtol=1e-5)
    assert jnp.allclose(hn, ref_hn, atol=1e-5, rtol=1e-5)

    # bf16 MXU-input path (f32 accumulation, f32 gate math): looser tolerance.
    out_bf, hn_bf = gru_forward(x, w_ih, w_hh, b_ih, b_hh, use_bf16=True)
    jax.block_until_ready((out_bf, hn_bf))
    assert jnp.allclose(out_bf, ref_out, atol=5e-2, rtol=5e-2)
    assert jnp.allclose(hn_bf, ref_hn, atol=5e-2, rtol=5e-2)

    print("KERNEL_OK")
</pallas_src>

<mosaic_0001>
module attributes {stable_mosaic.version = 11 : i64} {
  func.func @_gru_recurrent_kernel(%arg0: i32, %arg1: memref<8x8x96xf32, #tpu.memory_space<vmem>>, %arg2: memref<32x96xf32, #tpu.memory_space<vmem>>, %arg3: memref<1x32xf32, #tpu.memory_space<vmem>>, %arg4: memref<8x8x32xf32, #tpu.memory_space<vmem>>, %arg5: memref<8x32xf32, #tpu.memory_space<vmem>>) attributes {dimension_semantics = [#tpu.dimension_semantics<arbitrary>], iteration_bounds = array<i64: 1>, scalar_prefetch = 0 : i64, scratch_operands = 1 : i64, tpu.core_type = #tpu.core_type<tc>, window_params = [{transform_indices = @transform_0, window_bounds = array<i64: 8, 8, 96>}, {pipeline_mode = #tpu.pipeline_mode<synchronous>, transform_indices = @transform_1, window_bounds = array<i64: 32, 96>}, {pipeline_mode = #tpu.pipeline_mode<synchronous>, transform_indices = @transform_2, window_bounds = array<i64: 1, 32>}, {transform_indices = @transform_3, window_bounds = array<i64: 8, 8, 32>}]} {
    %c0_i32 = arith.constant 0 : i32
    %0 = arith.cmpi eq, %arg0, %c0_i32 : i32
    %1 = arith.extui %0 : i1 to i32
    %c0_i32_0 = arith.constant 0 : i32
    %2 = arith.cmpi ne, %1, %c0_i32_0 : i32
    scf.if %2 {
      %cst_64 = arith.constant 0.000000e+00 : f32
      %279 = vector.broadcast %cst_64 : f32 to vector<8x32xf32>
      %c0_65 = arith.constant 0 : index
      %c0_66 = arith.constant 0 : index
      %280 = vector.load %arg5[%c0_65, %c0_66] : memref<8x32xf32, #tpu.memory_space<vmem>>, vector<8x32xf32>
      tpu.vector_store %arg5[%c0_65, %c0_66], %279 {strides = array<i32>} : memref<8x32xf32, #tpu.memory_space<vmem>>, vector<8x32xf32>,
    } else {
    }
    %c0 = arith.constant 0 : index
    %c0_1 = arith.constant 0 : index
    %3 = vector.load %arg2[%c0, %c0_1] : memref<32x96xf32, #tpu.memory_space<vmem>>, vector<32x96xf32>
    %c0_2 = arith.constant 0 : index
    %c0_3 = arith.constant 0 : index
    %4 = vector.load %arg3[%c0_2, %c0_3] : memref<1x32xf32, #tpu.memory_space<vmem>>, vector<1x32xf32>
    %c0_4 = arith.constant 0 : index
    %c0_5 = arith.constant 0 : index
    %5 = vector.load %arg5[%c0_4, %c0_5] : memref<8x32xf32, #tpu.memory_space<vmem>>, vector<8x32xf32>
    %c0_i32_6 = arith.constant 0 : i32
    %6 = arith.index_cast %c0_i32_6 : i32 to index
    %c0_7 = arith.constant 0 : index
    %c0_8 = arith.constant 0 : index
    %7 = vector.load %arg1[%6, %c0_7, %c0_8] : memref<8x8x96xf32, #tpu.memory_space<vmem>>, vector<1x8x96xf32>
    %8 = vector.shape_cast %7 : vector<1x8x96xf32> to vector<8x96xf32>
    %cst = arith.constant dense<0.000000e+00> : vector<8x96xf32>
    %9 = tpu.matmul %5, %3, %cst {dimension_numbers = #tpu.dot_dimension_numbers<[1], [0], [0], [1], [0, 0, 1, 1], [], []>} : vector<8x32xf32>, vector<32x96xf32>, vector<8x96xf32> -> vector<8x96xf32>
    %10 = vector.extract_strided_slice %8 {offsets = [0, 0], sizes = [8, 32], strides = [1, 1]} : vector<8x96xf32> to vector<8x32xf32>
    %11 = vector.extract_strided_slice %9 {offsets = [0, 0], sizes = [8, 32], strides = [1, 1]} : vector<8x96xf32> to vector<8x32xf32>
    %12 = arith.addf %10, %11 : vector<8x32xf32>
    %13 = arith.negf %12 : vector<8x32xf32>
    %14 = math.exp %13 : vector<8x32xf32>
    %cst_9 = arith.constant 1.000000e+00 : f32
    %15 = vector.broadcast %cst_9 : f32 to vector<8x32xf32>
    %16 = arith.addf %15, %14 : vector<8x32xf32>
    %17 = arith.divf %15, %16 : vector<8x32xf32>
    %18 = vector.extract_strided_slice %8 {offsets = [0, 32], sizes = [8, 32], strides = [1, 1]} : vector<8x96xf32> to vector<8x32xf32>
    %19 = vector.extract_strided_slice %9 {offsets = [0, 32], sizes = [8, 32], strides = [1, 1]} : vector<8x96xf32> to vector<8x32xf32>
    %20 = arith.addf %18, %19 : vector<8x32xf32>
    %21 = arith.negf %20 : vector<8x32xf32>
    %22 = math.exp %21 : vector<8x32xf32>
    %cst_10 = arith.constant 1.000000e+00 : f32
    %23 = vector.broadcast %cst_10 : f32 to vector<8x32xf32>
    %24 = arith.addf %23, %22 : vector<8x32xf32>
    %25 = arith.divf %23, %24 : vector<8x32xf32>
    %26 = vector.extract_strided_slice %8 {offsets = [0, 64], sizes = [8, 32], strides = [1, 1]} : vector<8x96xf32> to vector<8x32xf32>
    %27 = vector.extract_strided_slice %9 {offsets = [0, 64], sizes = [8, 32], strides = [1, 1]} : vector<8x96xf32> to vector<8x32xf32>
    %28 = vector.broadcast %4 : vector<1x32xf32> to vector<8x32xf32>
    %29 = arith.addf %27, %28 : vector<8x32xf32>
    %30 = arith.mulf %17, %29 : vector<8x32xf32>
    %31 = arith.addf %26, %30 : vector<8x32xf32>
    %32 = math.tanh %31 : vector<8x32xf32>
    %33 = arith.subf %5, %32 : vector<8x32xf32>
    %34 = arith.mulf %25, %33 : vector<8x32xf32>
    %35 = arith.addf %32, %34 : vector<8x32xf32>
    %36 = arith.index_cast %c0_i32_6 : i32 to index
    %c0_11 = arith.constant 0 : index
    %c0_12 = arith.constant 0 : index
    %37 = vector.load %arg4[%36, %c0_11, %c0_12] : memref<8x8x32xf32, #tpu.memory_space<vmem>>, vector<1x8x32xf32>
    %38 = vector.shape_cast %37 : vector<1x8x32xf32> to vector<8x32xf32>
    %39 = vector.shape_cast %35 : vector<8x32xf32> to vector<1x8x32xf32>
    tpu.vector_store %arg4[%36, %c0_11, %c0_12], %39 {strides = array<i32>} : memref<8x8x32xf32, #tpu.memory_space<vmem>>, vector<1x8x32xf32>,
    %c1_i32 = arith.constant 1 : i32
    %40 = arith.index_cast %c1_i32 : i32 to index
    %c0_13 = arith.constant 0 : index
    %c0_14 = arith.constant 0 : index
    %41 = vector.load %arg1[%40, %c0_13, %c0_14] : memref<8x8x96xf32, #tpu.memory_space<vmem>>, vector<1x8x96xf32>
    %42 = vector.shape_cast %41 : vector<1x8x96xf32> to vector<8x96xf32>
    %cst_15 = arith.constant dense<0.000000e+00> : vector<8x96xf32>
    %43 = tpu.matmul %35, %3, %cst_15 {dimension_numbers = #tpu.dot_dimension_numbers<[1], [0], [0], [1], [0, 0, 1, 1], [], []>} : vector<8x32xf32>, vector<32x96xf32>, vector<8x96xf32> -> vector<8x96xf32>
    %44 = vector.extract_strided_slice %42 {offsets = [0, 0], sizes = [8, 32], strides = [1, 1]} : vector<8x96xf32> to vector<8x32xf32>
    %45 = vector.extract_strided_slice %43 {offsets = [0, 0], sizes = [8, 32], strides = [1, 1]} : vector<8x96xf32> to vector<8x32xf32>
    %46 = arith.addf %44, %45 : vector<8x32xf32>
    %47 = arith.negf %46 : vector<8x32xf32>
    %48 = math.exp %47 : vector<8x32xf32>
    %cst_16 = arith.constant 1.000000e+00 : f32
    %49 = vector.broadcast %cst_16 : f32 to vector<8x32xf32>
    %50 = arith.addf %49, %48 : vector<8x32xf32>
    %51 = arith.divf %49, %50 : vector<8x32xf32>
    %52 = vector.extract_strided_slice %42 {offsets = [0, 32], sizes = [8, 32], strides = [1, 1]} : vector<8x96xf32> to vector<8x32xf32>
    %53 = vector.extract_strided_slice %43 {offsets = [0, 32], sizes = [8, 32], strides = [1, 1]} : vector<8x96xf32> to vector<8x32xf32>
    %54 = arith.addf %52, %53 : vector<8x32xf32>
    %55 = arith.negf %54 : vector<8x32xf32>
    %56 = math.exp %55 : vector<8x32xf32>
    %cst_17 = arith.constant 1.000000e+00 : f32
    %57 = vector.broadcast %cst_17 : f32 to vector<8x32xf32>
    %58 = arith.addf %57, %56 : vector<8x32xf32>
    %59 = arith.divf %57, %58 : vector<8x32xf32>
    %60 = vector.extract_strided_slice %42 {offsets = [0, 64], sizes = [8, 32], strides = [1, 1]} : vector<8x96xf32> to vector<8x32xf32>
    %61 = vector.extract_strided_slice %43 {offsets = [0, 64], sizes = [8, 32], strides = [1, 1]} : vector<8x96xf32> to vector<8x32xf32>
    %62 = vector.broadcast %4 : vector<1x32xf32> to vector<8x32xf32>
    %63 = arith.addf %61, %62 : vector<8x32xf32>
    %64 = arith.mulf %51, %63 : vector<8x32xf32>
    %65 = arith.addf %60, %64 : vector<8x32xf32>
    %66 = math.tanh %65 : vector<8x32xf32>
    %67 = arith.subf %35, %66 : vector<8x32xf32>
    %68 = arith.mulf %59, %67 : vector<8x32xf32>
    %69 = arith.addf %66, %68 : vector<8x32xf32>
    %70 = arith.index_cast %c1_i32 : i32 to index
    %c0_18 = arith.constant 0 : index
    %c0_19 = arith.constant 0 : index
    %71 = vector.load %arg4[%70, %c0_18, %c0_19] : memref<8x8x32xf32, #tpu.memory_space<vmem>>, vector<1x8x32xf32>
    %72 = vector.shape_cast %71 : vector<1x8x32xf32> to vector<8x32xf32>
    %73 = vector.shape_cast %69 : vector<8x32xf32> to vector<1x8x32xf32>
    tpu.vector_store %arg4[%70, %c0_18, %c0_19], %73 {strides = array<i32>} : memref<8x8x32xf32, #tpu.memory_space<vmem>>, vector<1x8x32xf32>,
    %c2_i32 = arith.constant 2 : i32
    %74 = arith.index_cast %c2_i32 : i32 to index
    %c0_20 = arith.constant 0 : index
    %c0_21 = arith.constant 0 : index
    %75 = vector.load %arg1[%74, %c0_20, %c0_21] : memref<8x8x96xf32, #tpu.memory_space<vmem>>, vector<1x8x96xf32>
    %76 = vector.shape_cast %75 : vector<1x8x96xf32> to vector<8x96xf32>
    %cst_22 = arith.constant dense<0.000000e+00> : vector<8x96xf32>
    %77 = tpu.matmul %69, %3, %cst_22 {dimension_numbers = #tpu.dot_dimension_numbers<[1], [0], [0], [1], [0, 0, 1, 1], [], []>} : vector<8x32xf32>, vector<32x96xf32>, vector<8x96xf32> -> vector<8x96xf32>
    %78 = vector.extract_strided_slice %76 {offsets = [0, 0], sizes = [8, 32], strides = [1, 1]} : vector<8x96xf32> to vector<8x32xf32>
    %79 = vector.extract_strided_slice %77 {offsets = [0, 0], sizes = [8, 32], strides = [1, 1]} : vector<8x96xf32> to vector<8x32xf32>
    %80 = arith.addf %78, %79 : vector<8x32xf32>
    %81 = arith.negf %80 : vector<8x32xf32>
    %82 = math.exp %81 : vector<8x32xf32>
    %cst_23 = arith.constant 1.000000e+00 : f32
    %83 = vector.broadcast %cst_23 : f32 to vector<8x32xf32>
    %84 = arith.addf %83, %82 : vector<8x32xf32>
    %85 = arith.divf %83, %84 : vector<8x32xf32>
    %86 = vector.extract_strided_slice %76 {offsets = [0, 32], sizes = [8, 32], strides = [1, 1]} : vector<8x96xf32> to vector<8x32xf32>
    %87 = vector.extract_strided_slice %77 {offsets = [0, 32], sizes = [8, 32], strides = [1, 1]} : vector<8x96xf32> to vector<8x32xf32>
    %88 = arith.addf %86, %87 : vector<8x32xf32>
    %89 = arith.negf %88 : vector<8x32xf32>
    %90 = math.exp %89 : vector<8x32xf32>
    %cst_24 = arith.constant 1.000000e+00 : f32
    %91 = vector.broadcast %cst_24 : f32 to vector<8x32xf32>
    %92 = arith.addf %91, %90 : vector<8x32xf32>
    %93 = arith.divf %91, %92 : vector<8x32xf32>
    %94 = vector.extract_strided_slice %76 {offsets = [0, 64], sizes = [8, 32], strides = [1, 1]} : vector<8x96xf32> to vector<8x32xf32>
    %95 = vector.extract_strided_slice %77 {offsets = [0, 64], sizes = [8, 32], strides = [1, 1]} : vector<8x96xf32> to vector<8x32xf32>
    %96 = vector.broadcast %4 : vector<1x32xf32> to vector<8x32xf32>
    %97 = arith.addf %95, %96 : vector<8x32xf32>
    %98 = arith.mulf %85, %97 : vector<8x32xf32>
    %99 = arith.addf %94, %98 : vector<8x32xf32>
    %100 = math.tanh %99 : vector<8x32xf32>
    %101 = arith.subf %69, %100 : vector<8x32xf32>
    %102 = arith.mulf %93, %101 : vector<8x32xf32>
    %103 = arith.addf %100, %102 : vector<8x32xf32>
    %104 = arith.index_cast %c2_i32 : i32 to index
    %c0_25 = arith.constant 0 : index
    %c0_26 = arith.constant 0 : index
    %105 = vector.load %arg4[%104, %c0_25, %c0_26] : memref<8x8x32xf32, #tpu.memory_space<vmem>>, vector<1x8x32xf32>
    %106 = vector.shape_cast %105 : vector<1x8x32xf32> to vector<8x32xf32>
    %107 = vector.shape_cast %103 : vector<8x32xf32> to vector<1x8x32xf32>
    tpu.vector_store %arg4[%104, %c0_25, %c0_26], %107 {strides = array<i32>} : memref<8x8x32xf32, #tpu.memory_space<vmem>>, vector<1x8x32xf32>,
    %c3_i32 = arith.constant 3 : i32
    %108 = arith.index_cast %c3_i32 : i32 to index
    %c0_27 = arith.constant 0 : index
    %c0_28 = arith.constant 0 : index
    %109 = vector.load %arg1[%108, %c0_27, %c0_28] : memref<8x8x96xf32, #tpu.memory_space<vmem>>, vector<1x8x96xf32>
    %110 = vector.shape_cast %109 : vector<1x8x96xf32> to vector<8x96xf32>
    %cst_29 = arith.constant dense<0.000000e+00> : vector<8x96xf32>
    %111 = tpu.matmul %103, %3, %cst_29 {dimension_numbers = #tpu.dot_dimension_numbers<[1], [0], [0], [1], [0, 0, 1, 1], [], []>} : vector<8x32xf32>, vector<32x96xf32>, vector<8x96xf32> -> vector<8x96xf32>
    %112 = vector.extract_strided_slice %110 {offsets = [0, 0], sizes = [8, 32], strides = [1, 1]} : vector<8x96xf32> to vector<8x32xf32>
    %113 = vector.extract_strided_slice %111 {offsets = [0, 0], sizes = [8, 32], strides = [1, 1]} : vector<8x96xf32> to vector<8x32xf32>
    %114 = arith.addf %112, %113 : vector<8x32xf32>
    %115 = arith.negf %114 : vector<8x32xf32>
    %116 = math.exp %115 : vector<8x32xf32>
    %cst_30 = arith.constant 1.000000e+00 : f32
    %117 = vector.broadcast %cst_30 : f32 to vector<8x32xf32>
    %118 = arith.addf %117, %116 : vector<8x32xf32>
    %119 = arith.divf %117, %118 : vector<8x32xf32>
    %120 = vector.extract_strided_slice %110 {offsets = [0, 32], sizes = [8, 32], strides = [1, 1]} : vector<8x96xf32> to vector<8x32xf32>
    %121 = vector.extract_strided_slice %111 {offsets = [0, 32], sizes = [8, 32], strides = [1, 1]} : vector<8x96xf32> to vector<8x32xf32>
    %122 = arith.addf %120, %121 : vector<8x32xf32>
    %123 = arith.negf %122 : vector<8x32xf32>
    %124 = math.exp %123 : vector<8x32xf32>
    %cst_31 = arith.constant 1.000000e+00 : f32
    %125 = vector.broadcast %cst_31 : f32 to vector<8x32xf32>
    %126 = arith.addf %125, %124 : vector<8x32xf32>
    %127 = arith.divf %125, %126 : vector<8x32xf32>
    %128 = vector.extract_strided_slice %110 {offsets = [0, 64], sizes = [8, 32], strides = [1, 1]} : vector<8x96xf32> to vector<8x32xf32>
    %129 = vector.extract_strided_slice %111 {offsets = [0, 64], sizes = [8, 32], strides = [1, 1]} : vector<8x96xf32> to vector<8x32xf32>
    %130 = vector.broadcast %4 : vector<1x32xf32> to vector<8x32xf32>
    %131 = arith.addf %129, %130 : vector<8x32xf32>
    %132 = arith.mulf %119, %131 : vector<8x32xf32>
    %133 = arith.addf %128, %132 : vector<8x32xf32>
    %134 = math.tanh %133 : vector<8x32xf32>
    %135 = arith.subf %103, %134 : vector<8x32xf32>
    %136 = arith.mulf %127, %135 : vector<8x32xf32>
    %137 = arith.addf %134, %136 : vector<8x32xf32>
    %138 = arith.index_cast %c3_i32 : i32 to index
    %c0_32 = arith.constant 0 : index
    %c0_33 = arith.constant 0 : index
    %139 = vector.load %arg4[%138, %c0_32, %c0_33] : memref<8x8x32xf32, #tpu.memory_space<vmem>>, vector<1x8x32xf32>
    %140 = vector.shape_cast %139 : vector<1x8x32xf32> to vector<8x32xf32>
    %141 = vector.shape_cast %137 : vector<8x32xf32> to vector<1x8x32xf32>
    tpu.vector_store %arg4[%138, %c0_32, %c0_33], %141 {strides = array<i32>} : memref<8x8x32xf32, #tpu.memory_space<vmem>>, vector<1x8x32xf32>,
    %c4_i32 = arith.constant 4 : i32
    %142 = arith.index_cast %c4_i32 : i32 to index
    %c0_34 = arith.constant 0 : index
    %c0_35 = arith.constant 0 : index
    %143 = vector.load %arg1[%142, %c0_34, %c0_35] : memref<8x8x96xf32, #tpu.memory_space<vmem>>, vector<1x8x96xf32>
    %144 = vector.shape_cast %143 : vector<1x8x96xf32> to vector<8x96xf32>
    %cst_36 = arith.constant dense<0.000000e+00> : vector<8x96xf32>
    %145 = tpu.matmul %137, %3, %cst_36 {dimension_numbers = #tpu.dot_dimension_numbers<[1], [0], [0], [1], [0, 0, 1, 1], [], []>} : vector<8x32xf32>, vector<32x96xf32>, vector<8x96xf32> -> vector<8x96xf32>
    %146 = vector.extract_strided_slice %144 {offsets = [0, 0], sizes = [8, 32], strides = [1, 1]} : vector<8x96xf32> to vector<8x32xf32>
    %147 = vector.extract_strided_slice %145 {offsets = [0, 0], sizes = [8, 32], strides = [1, 1]} : vector<8x96xf32> to vector<8x32xf32>
    %148 = arith.addf %146, %147 : vector<8x32xf32>
    %149 = arith.negf %148 : vector<8x32xf32>
    %150 = math.exp %149 : vector<8x32xf32>
    %cst_37 = arith.constant 1.000000e+00 : f32
    %151 = vector.broadcast %cst_37 : f32 to vector<8x32xf32>
    %152 = arith.addf %151, %150 : vector<8x32xf32>
    %153 = arith.divf %151, %152 : vector<8x32xf32>
    %154 = vector.extract_strided_slice %144 {offsets = [0, 32], sizes = [8, 32], strides = [1, 1]} : vector<8x96xf32> to vector<8x32xf32>
    %155 = vector.extract_strided_slice %145 {offsets = [0, 32], sizes = [8, 32], strides = [1, 1]} : vector<8x96xf32> to vector<8x32xf32>
    %156 = arith.addf %154, %155 : vector<8x32xf32>
    %157 = arith.negf %156 : vector<8x32xf32>
    %158 = math.exp %157 : vector<8x32xf32>
    %cst_38 = arith.constant 1.000000e+00 : f32
    %159 = vector.broadcast %cst_38 : f32 to vector<8x32xf32>
    %160 = arith.addf %159, %158 : vector<8x32xf32>
    %161 = arith.divf %159, %160 : vector<8x32xf32>
    %162 = vector.extract_strided_slice %144 {offsets = [0, 64], sizes = [8, 32], strides = [1, 1]} : vector<8x96xf32> to vector<8x32xf32>
    %163 = vector.extract_strided_slice %145 {offsets = [0, 64], sizes = [8, 32], strides = [1, 1]} : vector<8x96xf32> to vector<8x32xf32>
    %164 = vector.broadcast %4 : vector<1x32xf32> to vector<8x32xf32>
    %165 = arith.addf %163, %164 : vector<8x32xf32>
    %166 = arith.mulf %153, %165 : vector<8x32xf32>
    %167 = arith.addf %162, %166 : vector<8x32xf32>
    %168 = math.tanh %167 : vector<8x32xf32>
    %169 = arith.subf %137, %168 : vector<8x32xf32>
    %170 = arith.mulf %161, %169 : vector<8x32xf32>
    %171 = arith.addf %168, %170 : vector<8x32xf32>
    %172 = arith.index_cast %c4_i32 : i32 to index
    %c0_39 = arith.constant 0 : index
    %c0_40 = arith.constant 0 : index
    %173 = vector.load %arg4[%172, %c0_39, %c0_40] : memref<8x8x32xf32, #tpu.memory_space<vmem>>, vector<1x8x32xf32>
    %174 = vector.shape_cast %173 : vector<1x8x32xf32> to vector<8x32xf32>
    %175 = vector.shape_cast %171 : vector<8x32xf32> to vector<1x8x32xf32>
    tpu.vector_store %arg4[%172, %c0_39, %c0_40], %175 {strides = array<i32>} : memref<8x8x32xf32, #tpu.memory_space<vmem>>, vector<1x8x32xf32>,
    %c5_i32 = arith.constant 5 : i32
    %176 = arith.index_cast %c5_i32 : i32 to index
    %c0_41 = arith.constant 0 : index
    %c0_42 = arith.constant 0 : index
    %177 = vector.load %arg1[%176, %c0_41, %c0_42] : memref<8x8x96xf32, #tpu.memory_space<vmem>>, vector<1x8x96xf32>
    %178 = vector.shape_cast %177 : vector<1x8x96xf32> to vector<8x96xf32>
    %cst_43 = arith.constant dense<0.000000e+00> : vector<8x96xf32>
    %179 = tpu.matmul %171, %3, %cst_43 {dimension_numbers = #tpu.dot_dimension_numbers<[1], [0], [0], [1], [0, 0, 1, 1], [], []>} : vector<8x32xf32>, vector<32x96xf32>, vector<8x96xf32> -> vector<8x96xf32>
    %180 = vector.extract_strided_slice %178 {offsets = [0, 0], sizes = [8, 32], strides = [1, 1]} : vector<8x96xf32> to vector<8x32xf32>
    %181 = vector.extract_strided_slice %179 {offsets = [0, 0], sizes = [8, 32], strides = [1, 1]} : vector<8x96xf32> to vector<8x32xf32>
    %182 = arith.addf %180, %181 : vector<8x32xf32>
    %183 = arith.negf %182 : vector<8x32xf32>
    %184 = math.exp %183 : vector<8x32xf32>
    %cst_44 = arith.constant 1.000000e+00 : f32
    %185 = vector.broadcast %cst_44 : f32 to vector<8x32xf32>
    %186 = arith.addf %185, %184 : vector<8x32xf32>
    %187 = arith.divf %185, %186 : vector<8x32xf32>
    %188 = vector.extract_strided_slice %178 {offsets = [0, 32], sizes = [8, 32], strides = [1, 1]} : vector<8x96xf32> to vector<8x32xf32>
    %189 = vector.extract_strided_slice %179 {offsets = [0, 32], sizes = [8, 32], strides = [1, 1]} : vector<8x96xf32> to vector<8x32xf32>
    %190 = arith.addf %188, %189 : vector<8x32xf32>
    %191 = arith.negf %190 : vector<8x32xf32>
    %192 = math.exp %191 : vector<8x32xf32>
    %cst_45 = arith.constant 1.000000e+00 : f32
    %193 = vector.broadcast %cst_45 : f32 to vector<8x32xf32>
    %194 = arith.addf %193, %192 : vector<8x32xf32>
    %195 = arith.divf %193, %194 : vector<8x32xf32>
    %196 = vector.extract_strided_slice %178 {offsets = [0, 64], sizes = [8, 32], strides = [1, 1]} : vector<8x96xf32> to vector<8x32xf32>
    %197 = vector.extract_strided_slice %179 {offsets = [0, 64], sizes = [8, 32], strides = [1, 1]} : vector<8x96xf32> to vector<8x32xf32>
    %198 = vector.broadcast %4 : vector<1x32xf32> to vector<8x32xf32>
    %199 = arith.addf %197, %198 : vector<8x32xf32>
    %200 = arith.mulf %187, %199 : vector<8x32xf32>
    %201 = arith.addf %196, %200 : vector<8x32xf32>
    %202 = math.tanh %201 : vector<8x32xf32>
    %203 = arith.subf %171, %202 : vector<8x32xf32>
    %204 = arith.mulf %195, %203 : vector<8x32xf32>
    %205 = arith.addf %202, %204 : vector<8x32xf32>
    %206 = arith.index_cast %c5_i32 : i32 to index
    %c0_46 = arith.constant 0 : index
    %c0_47 = arith.constant 0 : index
    %207 = vector.load %arg4[%206, %c0_46, %c0_47] : memref<8x8x32xf32, #tpu.memory_space<vmem>>, vector<1x8x32xf32>
    %208 = vector.shape_cast %207 : vector<1x8x32xf32> to vector<8x32xf32>
    %209 = vector.shape_cast %205 : vector<8x32xf32> to vector<1x8x32xf32>
    tpu.vector_store %arg4[%206, %c0_46, %c0_47], %209 {strides = array<i32>} : memref<8x8x32xf32, #tpu.memory_space<vmem>>, vector<1x8x32xf32>,
    %c6_i32 = arith.constant 6 : i32
    %210 = arith.index_cast %c6_i32 : i32 to index
    %c0_48 = arith.constant 0 : index
    %c0_49 = arith.constant 0 : index
    %211 = vector.load %arg1[%210, %c0_48, %c0_49] : memref<8x8x96xf32, #tpu.memory_space<vmem>>, vector<1x8x96xf32>
    %212 = vector.shape_cast %211 : vector<1x8x96xf32> to vector<8x96xf32>
    %cst_50 = arith.constant dense<0.000000e+00> : vector<8x96xf32>
    %213 = tpu.matmul %205, %3, %cst_50 {dimension_numbers = #tpu.dot_dimension_numbers<[1], [0], [0], [1], [0, 0, 1, 1], [], []>} : vector<8x32xf32>, vector<32x96xf32>, vector<8x96xf32> -> vector<8x96xf32>
    %214 = vector.extract_strided_slice %212 {offsets = [0, 0], sizes = [8, 32], strides = [1, 1]} : vector<8x96xf32> to vector<8x32xf32>
    %215 = vector.extract_strided_slice %213 {offsets = [0, 0], sizes = [8, 32], strides = [1, 1]} : vector<8x96xf32> to vector<8x32xf32>
    %216 = arith.addf %214, %215 : vector<8x32xf32>
    %217 = arith.negf %216 : vector<8x32xf32>
    %218 = math.exp %217 : vector<8x32xf32>
    %cst_51 = arith.constant 1.000000e+00 : f32
    %219 = vector.broadcast %cst_51 : f32 to vector<8x32xf32>
    %220 = arith.addf %219, %218 : vector<8x32xf32>
    %221 = arith.divf %219, %220 : vector<8x32xf32>
    %222 = vector.extract_strided_slice %212 {offsets = [0, 32], sizes = [8, 32], strides = [1, 1]} : vector<8x96xf32> to vector<8x32xf32>
    %223 = vector.extract_strided_slice %213 {offsets = [0, 32], sizes = [8, 32], strides = [1, 1]} : vector<8x96xf32> to vector<8x32xf32>
    %224 = arith.addf %222, %223 : vector<8x32xf32>
    %225 = arith.negf %224 : vector<8x32xf32>
    %226 = math.exp %225 : vector<8x32xf32>
    %cst_52 = arith.constant 1.000000e+00 : f32
    %227 = vector.broadcast %cst_52 : f32 to vector<8x32xf32>
    %228 = arith.addf %227, %226 : vector<8x32xf32>
    %229 = arith.divf %227, %228 : vector<8x32xf32>
    %230 = vector.extract_strided_slice %212 {offsets = [0, 64], sizes = [8, 32], strides = [1, 1]} : vector<8x96xf32> to vector<8x32xf32>
    %231 = vector.extract_strided_slice %213 {offsets = [0, 64], sizes = [8, 32], strides = [1, 1]} : vector<8x96xf32> to vector<8x32xf32>
    %232 = vector.broadcast %4 : vector<1x32xf32> to vector<8x32xf32>
    %233 = arith.addf %231, %232 : vector<8x32xf32>
    %234 = arith.mulf %221, %233 : vector<8x32xf32>
    %235 = arith.addf %230, %234 : vector<8x32xf32>
    %236 = math.tanh %235 : vector<8x32xf32>
    %237 = arith.subf %205, %236 : vector<8x32xf32>
    %238 = arith.mulf %229, %237 : vector<8x32xf32>
    %239 = arith.addf %236, %238 : vector<8x32xf32>
    %240 = arith.index_cast %c6_i32 : i32 to index
    %c0_53 = arith.constant 0 : index
    %c0_54 = arith.constant 0 : index
    %241 = vector.load %arg4[%240, %c0_53, %c0_54] : memref<8x8x32xf32, #tpu.memory_space<vmem>>, vector<1x8x32xf32>
    %242 = vector.shape_cast %241 : vector<1x8x32xf32> to vector<8x32xf32>
    %243 = vector.shape_cast %239 : vector<8x32xf32> to vector<1x8x32xf32>
    tpu.vector_store %arg4[%240, %c0_53, %c0_54], %243 {strides = array<i32>} : memref<8x8x32xf32, #tpu.memory_space<vmem>>, vector<1x8x32xf32>,
    %c7_i32 = arith.constant 7 : i32
    %244 = arith.index_cast %c7_i32 : i32 to index
    %c0_55 = arith.constant 0 : index
    %c0_56 = arith.constant 0 : index
    %245 = vector.load %arg1[%244, %c0_55, %c0_56] : memref<8x8x96xf32, #tpu.memory_space<vmem>>, vector<1x8x96xf32>
    %246 = vector.shape_cast %245 : vector<1x8x96xf32> to vector<8x96xf32>
    %cst_57 = arith.constant dense<0.000000e+00> : vector<8x96xf32>
    %247 = tpu.matmul %239, %3, %cst_57 {dimension_numbers = #tpu.dot_dimension_numbers<[1], [0], [0], [1], [0, 0, 1, 1], [], []>} : vector<8x32xf32>, vector<32x96xf32>, vector<8x96xf32> -> vector<8x96xf32>
    %248 = vector.extract_strided_slice %246 {offsets = [0, 0], sizes = [8, 32], strides = [1, 1]} : vector<8x96xf32> to vector<8x32xf32>
    %249 = vector.extract_strided_slice %247 {offsets = [0, 0], sizes = [8, 32], strides = [1, 1]} : vector<8x96xf32> to vector<8x32xf32>
    %250 = arith.addf %248, %249 : vector<8x32xf32>
    %251 = arith.negf %250 : vector<8x32xf32>
    %252 = math.exp %251 : vector<8x32xf32>
    %cst_58 = arith.constant 1.000000e+00 : f32
    %253 = vector.broadcast %cst_58 : f32 to vector<8x32xf32>
    %254 = arith.addf %253, %252 : vector<8x32xf32>
    %255 = arith.divf %253, %254 : vector<8x32xf32>
    %256 = vector.extract_strided_slice %246 {offsets = [0, 32], sizes = [8, 32], strides = [1, 1]} : vector<8x96xf32> to vector<8x32xf32>
    %257 = vector.extract_strided_slice %247 {offsets = [0, 32], sizes = [8, 32], strides = [1, 1]} : vector<8x96xf32> to vector<8x32xf32>
    %258 = arith.addf %256, %257 : vector<8x32xf32>
    %259 = arith.negf %258 : vector<8x32xf32>
    %260 = math.exp %259 : vector<8x32xf32>
    %cst_59 = arith.constant 1.000000e+00 : f32
    %261 = vector.broadcast %cst_59 : f32 to vector<8x32xf32>
    %262 = arith.addf %261, %260 : vector<8x32xf32>
    %263 = arith.divf %261, %262 : vector<8x32xf32>
    %264 = vector.extract_strided_slice %246 {offsets = [0, 64], sizes = [8, 32], strides = [1, 1]} : vector<8x96xf32> to vector<8x32xf32>
    %265 = vector.extract_strided_slice %247 {offsets = [0, 64], sizes = [8, 32], strides = [1, 1]} : vector<8x96xf32> to vector<8x32xf32>
    %266 = vector.broadcast %4 : vector<1x32xf32> to vector<8x32xf32>
    %267 = arith.addf %265, %266 : vector<8x32xf32>
    %268 = arith.mulf %255, %267 : vector<8x32xf32>
    %269 = arith.addf %264, %268 : vector<8x32xf32>
    %270 = math.tanh %269 : vector<8x32xf32>
    %271 = arith.subf %239, %270 : vector<8x32xf32>
    %272 = arith.mulf %263, %271 : vector<8x32xf32>
    %273 = arith.addf %270, %272 : vector<8x32xf32>
    %274 = arith.index_cast %c7_i32 : i32 to index
    %c0_60 = arith.constant 0 : index
    %c0_61 = arith.constant 0 : index
    %275 = vector.load %arg4[%274, %c0_60, %c0_61] : memref<8x8x32xf32, #tpu.memory_space<vmem>>, vector<1x8x32xf32>
    %276 = vector.shape_cast %275 : vector<1x8x32xf32> to vector<8x32xf32>
    %277 = vector.shape_cast %273 : vector<8x32xf32> to vector<1x8x32xf32>
    tpu.vector_store %arg4[%274, %c0_60, %c0_61], %277 {strides = array<i32>} : memref<8x8x32xf32, #tpu.memory_space<vmem>>, vector<1x8x32xf32>,
    %c8_i32 = arith.constant 8 : i32
    %c0_62 = arith.constant 0 : index
    %c0_63 = arith.constant 0 : index
    %278 = vector.load %arg5[%c0_62, %c0_63] : memref<8x32xf32, #tpu.memory_space<vmem>>, vector<8x32xf32>
    tpu.vector_store %arg5[%c0_62, %c0_63], %273 {strides = array<i32>} : memref<8x32xf32, #tpu.memory_space<vmem>>, vector<8x32xf32>,
    return
  }
  func.func @transform_0(%arg0: i32) -> (i32, i32, i32) {
    %c0_i32 = arith.constant 0 : i32
    %c0_i32_0 = arith.constant 0 : i32
    %c0_i32_1 = arith.constant 0 : i32
    return %arg0, %c0_i32, %c0_i32_0 : i32, i32, i32
  }
  func.func @transform_1(%arg0: i32) -> (i32, i32) {
    %c0_i32 = arith.constant 0 : i32
    %c0_i32_0 = arith.constant 0 : i32
    %c0_i32_1 = arith.constant 0 : i32
    return %c0_i32, %c0_i32_0 : i32, i32
  }
  func.func @transform_2(%arg0: i32) -> (i32, i32) {
    %c0_i32 = arith.constant 0 : i32
    %c0_i32_0 = arith.constant 0 : i32
    %c0_i32_1 = arith.constant 0 : i32
    return %c0_i32, %c0_i32_0 : i32, i32
  }
  func.func @transform_3(%arg0: i32) -> (i32, i32, i32) {
    %c0_i32 = arith.constant 0 : i32
    %c0_i32_0 = arith.constant 0 : i32
    %c0_i32_1 = arith.constant 0 : i32
    return %arg0, %c0_i32, %c0_i32_0 : i32, i32, i32
  }
}

</mosaic_0001>

<bundles_post_ra>
// kernel: gru_forward.1
= control target key start
LH: loop header
LB: loop body
LE: loop exit
PB: predicated region body
PF: predicated region fallthrough
CT: control target
= control target key end

     0   :  { %vm18_vm0 = vcmask 261120   ;;  %v707_v2 = vmov 0.0   ;;  %s708_s20 = smov 64   ;;  %s709_s23 = smov 32   ;;  %s864_s1 = inlined_call_operand.vmem [shape: f32[32,96], index: 1, kind: input, shape index: {}]   ;;  %s865_s2 = inlined_call_operand.vmem [shape: f32[1,32], index: 2, kind: input, shape index: {}]   ;;  %s866_s0 = inlined_call_operand.vmem [shape: f32[8,8,96], index: 0, kind: input, shape index: {}]   ;;  %s867_s3 = inlined_call_operand.vmem [shape: f32[8,8,32], index: 3, kind: output, shape index: {}]  }
   0x1   :  { %v23_v0 = vld [vmem:[%s864_s1 + $0x18] sm:$0xff]  ;;  %v22_v1 = vld [vmem:[%s864_s1 + $0x10] sm:$0xff]  ;;  %19 = vst.msk [vmem:[#allocation2] sm:$0xff] %vm18_vm0, %v707_v2  ;;  %v658_v3 = vld [vmem:[%s865_s2] ss:$0 sm:$0xff]  ;;  %s710_s28 = smov 96  }
   0x2   :  { %43 = vmatpush.msra.mxu0 %v23_v0  ;;  %124 = vmatpush.msra.mxu1 %v23_v0  ;;  %v21_v4 = vld [vmem:[%s864_s1 + $0x8] sm:$0xff]  ;;  %v20_v5 = vld [vmem:[%s864_s1] sm:$0xff] }
   0x3   :  { %197 = vmatpush.msra.mxu2 %v23_v0  ;;  %270 = vmatpush.msra.mxu3 %v23_v0  ;;  %v26_v10 = vld [vmem:[%s866_s0] sm:$0xff]  ;;  %v626_v39 = vld [vmem:[%s866_s0 + $0x8] sm:$0xff] }
   0x4   :  { %44 = vmatpush.msra.mxu0 %v22_v1  ;;  %73 = vrot.lane.b32.xlu0 %v658_v3, %s708_s20  ;;  %v630_v3 = vld [vmem:[%s866_s0 + $0x10] sm:$0xff] }
   0x5   :  { %125 = vmatpush.msra.mxu1 %v22_v1  ;;  %198 = vmatpush.msra.mxu2 %v22_v1 }
   0x6   :  { %45 = vmatpush.msra.mxu0 %v21_v4  ;;  %271 = vmatpush.msra.mxu3 %v22_v1 }
   0x7   :  { %126 = vmatpush.msra.mxu1 %v21_v4  ;;  %199 = vmatpush.msra.mxu2 %v21_v4 }
   0x8   :  { %46 = vmatpush.msra.mxu0 %v20_v5  ;;  %v25_v6 = vld [vmem:[#allocation2] sm:$0xff]  ;;  %272 = vmatpush.msra.mxu3 %v21_v4 }
   0x9   :  { %624 = vmatmul.msk.f32.vlgmr.msra.gmra.mxu0 %vm18_vm0, %v25_v6  ;;  %127 = vmatpush.msra.mxu1 %v20_v5 }
   0xa   :  { %200 = vmatpush.msra.mxu2 %v20_v5  ;;  %273 = vmatpush.msra.mxu3 %v20_v5 }
   0xb   :  { %343 = vmatpush.msrb.mxu0 %v23_v0  ;;  %416 = vmatpush.msrb.mxu1 %v23_v0 }
   0xc   :  { %489 = vmatpush.msrb.mxu2 %v23_v0  ;;  %562 = vmatpush.msrb.mxu3 %v23_v0 }
   0xd   :  { %344 = vmatpush.msrb.mxu0 %v22_v1  ;;  %417 = vmatpush.msrb.mxu1 %v22_v1 }
   0xe   :  { %490 = vmatpush.msrb.mxu2 %v22_v1  ;;  %563 = vmatpush.msrb.mxu3 %v22_v1 }
   0xf   :  { %345 = vmatpush.msrb.mxu0 %v21_v4  ;;  %418 = vmatpush.msrb.mxu1 %v21_v4 }
  0x10   :  { %491 = vmatpush.msrb.mxu2 %v21_v4  ;;  %564 = vmatpush.msrb.mxu3 %v21_v4 }
  0x11   :  { %346 = vmatpush.msrb.mxu0 %v20_v5  ;;  %419 = vmatpush.msrb.mxu1 %v20_v5 }
  0x12   :  { %492 = vmatpush.msrb.mxu2 %v20_v5  ;;  %565 = vmatpush.msrb.mxu3 %v20_v5 }
  0x76   :  { %v749_v7 = vpop.permute.xlu0 %73 }
  0x86   :  { %v48_v8 = vpop.f32.mrf.mxu0 }
  0x87   :  { %v76_v9 = vadd.f32 %v749_v7, %v48_v8  ;;  %v51_v11 = vadd.f32 %v48_v8, %v26_v10 }
  0x89   :  { %78 = vrot.lane.b32.xlu0 %v76_v9, %s708_s20  ;;  %v625_v12 = vmul.f32 -1.442695, %v51_v11 }
  0x8b   :  { %659 = vpow2.f32 %v625_v12 }
  0x91   :  { %v660_v13 = vpop.eup %659 }
  0x92   :  { %v55_v14 = vadd.f32 1.0, %v660_v13 }
  0x94   :  { %661 = vrcp.f32 %v55_v14  ;;  %v67_v20 = vand.u32 2147483648, %v55_v14  ;;  %vm61_vm2 = vweird.f32 %v55_v14  ;;  %v65_v21 = vand.u32 2147483647, %v55_v14 }
  0x96   :  { %v68_v23 = vor.u32 1.1754944e-38, %v67_v20  ;;  %vm66_vm4 = vcmp.eq.f32.partialorder %v65_v21, 8.507059e+37 }
  0x9a   :  { %v662_v15 = vpop.eup %661 }
  0x9b   :  { %v57_v16 = vmul.f32 %v662_v15, %v55_v14  ;;  %vm62_vm1 = vweird.f32 %v662_v15 }
  0x9c   :  { %vm63_vm3 = vmor %vm61_vm2, %vm62_vm1 }
  0x9d   :  { %v58_v17 = vsub.f32 1.0, %v57_v16 }
  0x9f   :  { %v59_v18 = vmul.f32 %v662_v15, %v58_v17 }
  0xa1   :  { %v60_v19 = vadd.f32 %v662_v15, %v59_v18 }
  0xa3   :  { %v64_v22 = vsel %vm63_vm3, %v662_v15, %v60_v19 }
  0xa4   :  { %v69_v25 = vsel %vm66_vm4, %v68_v23, %v64_v22 }
  0xfb   :  { %v79_v24 = vpop.permute.xlu0 %78 }
  0xfc   :  { %v81_v26 = vmul.f32 %v79_v24, %v69_v25 }
  0xfe   :  { %83 = vrot.lane.b32.xlu1 %v81_v26, %s708_s20 }
 0x170   :  { %v84_v27 = vpop.permute.xlu1 %83 }
 0x171   :  { %v86_v28 = vadd.f32 %v84_v27, %v26_v10 }
 0x173   :  { %663 = vtanh.f32 %v86_v28 }
 0x179   :  { %v664_v29 = vpop.eup %663 }
 0x17a   :  { %89 = vrot.lane.b32.xlu1 %v664_v29, %s708_s20 }
 0x1ec   :  { %v90_v30 = vpop.permute.xlu1 %89 }
 0x1ed   :  { %v92_v31 = vsub.f32 %v25_v6, %v90_v30 }
 0x1ef   :  { %94 = vrot.lane.b32.xlu2 %v92_v31, %s709_s23 }
 0x249   :  { %v95_v32 = vpop.permute.xlu2 %94 }
 0x24a   :  { %v97_v33 = vmul.f32 %v95_v32, %v69_v25  ;;  %v634_v32 = vld [vmem:[%s866_s0 + $0x18] sm:$0xff] }
 0x24c   :  { %99 = vrot.lane.b32.xlu2 %v97_v33, %s709_s23 }
 0x2a6   :  { %v100_v34 = vpop.permute.xlu2 %99 }
 0x2a7   :  { %v102_v35 = vadd.f32 %v664_v29, %v100_v34 }
 0x2a9   :  { %104 = vrot.lane.b32.xlu0 %v102_v35, %s708_s20 }
 0x31b   :  { %v105_v36 = vpop.permute.xlu0 %104 }
 0x31c   :  { %107 = vst.msk [vmem:[%s867_s3] sm:$0xff] %vm18_vm0, %v105_v36  ;;  %627 = vmatmul.msk.f32.vlgmr.msra.gmra.mxu1 %vm18_vm0, %v105_v36 }
 0x399   :  { %v129_v37 = vpop.f32.mrf.mxu1 }
 0x39a   :  { %v152_v38 = vadd.f32 %v129_v37, %v749_v7  ;;  %v132_v40 = vadd.f32 %v626_v39, %v129_v37 }
 0x39c   :  { %154 = vrot.lane.b32.xlu1 %v152_v38, %s708_s20  ;;  %v628_v41 = vmul.f32 -1.442695, %v132_v40 }
 0x39e   :  { %665 = vpow2.f32 %v628_v41 }
 0x3a4   :  { %v666_v42 = vpop.eup %665 }
 0x3a5   :  { %v136_v43 = vadd.f32 1.0, %v666_v42 }
 0x3a7   :  { %667 = vrcp.f32 %v136_v43  ;;  %v148_v49 = vand.u32 2147483648, %v136_v43  ;;  %vm142_vm6 = vweird.f32 %v136_v43  ;;  %v146_v50 = vand.u32 2147483647, %v136_v43 }
 0x3a9   :  { %v149_v52 = vor.u32 1.1754944e-38, %v148_v49  ;;  %vm147_vm8 = vcmp.eq.f32.partialorder %v146_v50, 8.507059e+37 }
 0x3ad   :  { %v668_v44 = vpop.eup %667 }
 0x3ae   :  { %v138_v45 = vmul.f32 %v668_v44, %v136_v43  ;;  %vm143_vm5 = vweird.f32 %v668_v44 }
 0x3af   :  { %vm144_vm7 = vmor %vm142_vm6, %vm143_vm5 }
 0x3b0   :  { %v139_v46 = vsub.f32 1.0, %v138_v45 }
 0x3b2   :  { %v140_v47 = vmul.f32 %v668_v44, %v139_v46 }
 0x3b4   :  { %v141_v48 = vadd.f32 %v668_v44, %v140_v47 }
 0x3b6   :  { %v145_v51 = vsel %vm144_vm7, %v668_v44, %v141_v48 }
 0x3b7   :  { %v150_v54 = vsel %vm147_vm8, %v149_v52, %v145_v51 }
 0x40e   :  { %v155_v53 = vpop.permute.xlu1 %154 }
 0x40f   :  { %v157_v55 = vmul.f32 %v155_v53, %v150_v54 }
 0x411   :  { %159 = vrot.lane.b32.xlu2 %v157_v55, %s708_s20 }
 0x46b   :  { %v160_v56 = vpop.permute.xlu2 %159 }
 0x46c   :  { %v162_v57 = vadd.f32 %v626_v39, %v160_v56 }
 0x46e   :  { %669 = vtanh.f32 %v162_v57 }
 0x474   :  { %v670_v58 = vpop.eup %669 }
 0x475   :  { %v164_v59 = vsub.f32 %v102_v35, %v670_v58 }
 0x477   :  { %166 = vrot.lane.b32.xlu0 %v164_v59, %s710_s28 }
 0x4e9   :  { %v167_v60 = vpop.permute.xlu0 %166 }
 0x4ea   :  { %v169_v61 = vmul.f32 %v167_v60, %v150_v54  ;;  %v638_v60 = vld [vmem:[%s866_s0 + $0x20] sm:$0xff] }
 0x4ec   :  { %171 = vrot.lane.b32.xlu1 %v169_v61, %s709_s23 }
 0x55e   :  { %v172_v62 = vpop.permute.xlu1 %171 }
 0x55f   :  { %v174_v63 = vadd.f32 %v670_v58, %v172_v62 }
 0x561   :  { %176 = vrot.lane.b32.xlu2 %v174_v63, %s708_s20 }
 0x5bb   :  { %v177_v0 = vpop.permute.xlu2 %176 }
 0x5bc   :  { %629 = vst.msk [vmem:[%s867_s3 + $0x8] sm:$0xff] %vm18_vm0, %v177_v0  ;;  %631 = vmatmul.msk.f32.vlgmr.msra.gmra.mxu2 %vm18_vm0, %v177_v0 }
 0x63f   :  { %v202_v1 = vpop.f32.mrf.mxu2 }
 0x640   :  { %v225_v2 = vadd.f32 %v202_v1, %v749_v7  ;;  %v205_v4 = vadd.f32 %v630_v3, %v202_v1 }
 0x642   :  { %227 = vrot.lane.b32.xlu0 %v225_v2, %s708_s20  ;;  %v632_v5 = vmul.f32 -1.442695, %v205_v4 }
 0x644   :  { %671 = vpow2.f32 %v632_v5 }
 0x64a   :  { %v672_v6 = vpop.eup %671 }
 0x64b   :  { %v209_v8 = vadd.f32 1.0, %v672_v6 }
 0x64d   :  { %673 = vrcp.f32 %v209_v8  ;;  %v221_v14 = vand.u32 2147483648, %v209_v8  ;;  %vm215_vm10 = vweird.f32 %v209_v8  ;;  %v219_v15 = vand.u32 2147483647, %v209_v8 }
 0x64f   :  { %v222_v17 = vor.u32 1.1754944e-38, %v221_v14  ;;  %vm220_vm12 = vcmp.eq.f32.partialorder %v219_v15, 8.507059e+37 }
 0x653   :  { %v674_v9 = vpop.eup %673 }
 0x654   :  { %v211_v10 = vmul.f32 %v674_v9, %v209_v8  ;;  %vm216_vm9 = vweird.f32 %v674_v9 }
 0x655   :  { %vm217_vm11 = vmor %vm215_vm10, %vm216_vm9 }
 0x656   :  { %v212_v11 = vsub.f32 1.0, %v211_v10 }
 0x658   :  { %v213_v12 = vmul.f32 %v674_v9, %v212_v11 }
 0x65a   :  { %v214_v13 = vadd.f32 %v674_v9, %v213_v12 }
 0x65c   :  { %v218_v16 = vsel %vm217_vm11, %v674_v9, %v214_v13 }
 0x65d   :  { %v223_v19 = vsel %vm220_vm12, %v222_v17, %v218_v16 }
 0x6b4   :  { %v228_v18 = vpop.permute.xlu0 %227 }
 0x6b5   :  { %v230_v20 = vmul.f32 %v228_v18, %v223_v19 }
 0x6b7   :  { %232 = vrot.lane.b32.xlu1 %v230_v20, %s708_s20 }
 0x729   :  { %v233_v21 = vpop.permute.xlu1 %232 }
 0x72a   :  { %v235_v22 = vadd.f32 %v630_v3, %v233_v21 }
 0x72c   :  { %675 = vtanh.f32 %v235_v22 }
 0x732   :  { %v676_v23 = vpop.eup %675 }
 0x733   :  { %v237_v24 = vsub.f32 %v174_v63, %v676_v23 }
 0x735   :  { %239 = vrot.lane.b32.xlu2 %v237_v24, %s710_s28 }
 0x78f   :  { %v240_v25 = vpop.permute.xlu2 %239 }
 0x790   :  { %v242_v26 = vmul.f32 %v240_v25, %v223_v19  ;;  %v642_v25 = vld [vmem:[%s866_s0 + $0x28] sm:$0xff] }
 0x792   :  { %244 = vrot.lane.b32.xlu0 %v242_v26, %s709_s23 }
 0x804   :  { %v245_v27 = vpop.permute.xlu0 %244 }
 0x805   :  { %v247_v28 = vadd.f32 %v676_v23, %v245_v27 }
 0x807   :  { %249 = vrot.lane.b32.xlu1 %v247_v28, %s708_s20 }
 0x879   :  { %v250_v29 = vpop.permute.xlu1 %249 }
 0x87a   :  { %633 = vst.msk [vmem:[%s867_s3 + $0x10] sm:$0xff] %vm18_vm0, %v250_v29  ;;  %635 = vmatmul.msk.f32.vlgmr.msra.gmra.mxu3 %vm18_vm0, %v250_v29 }
 0x8fd   :  { %v275_v30 = vpop.f32.mrf.mxu3 }
 0x8fe   :  { %v298_v31 = vadd.f32 %v275_v30, %v749_v7  ;;  %v278_v33 = vadd.f32 %v634_v32, %v275_v30 }
 0x900   :  { %300 = vrot.lane.b32.xlu2 %v298_v31, %s708_s20  ;;  %v636_v34 = vmul.f32 -1.442695, %v278_v33 }
 0x902   :  { %677 = vpow2.f32 %v636_v34 }
 0x908   :  { %v678_v35 = vpop.eup %677 }
 0x909   :  { %v282_v36 = vadd.f32 1.0, %v678_v35 }
 0x90b   :  { %679 = vrcp.f32 %v282_v36  ;;  %v294_v42 = vand.u32 2147483648, %v282_v36  ;;  %vm288_vm14 = vweird.f32 %v282_v36  ;;  %v292_v43 = vand.u32 2147483647, %v282_v36 }
 0x90d   :  { %v295_v45 = vor.u32 1.1754944e-38, %v294_v42  ;;  %vm293_vm1 = vcmp.eq.f32.partialorder %v292_v43, 8.507059e+37 }
 0x911   :  { %v680_v37 = vpop.eup %679 }
 0x912   :  { %v284_v38 = vmul.f32 %v680_v37, %v282_v36  ;;  %vm289_vm13 = vweird.f32 %v680_v37 }
 0x913   :  { %vm290_vm15 = vmor %vm288_vm14, %vm289_vm13 }
 0x914   :  { %v285_v39 = vsub.f32 1.0, %v284_v38 }
 0x916   :  { %v286_v40 = vmul.f32 %v680_v37, %v285_v39 }
 0x918   :  { %v287_v41 = vadd.f32 %v680_v37, %v286_v40 }
 0x91a   :  { %v291_v44 = vsel %vm290_vm15, %v680_v37, %v287_v41 }
 0x91b   :  { %v296_v47 = vsel %vm293_vm1, %v295_v45, %v291_v44 }
 0x95a   :  { %v301_v46 = vpop.permute.xlu2 %300 }
 0x95b   :  { %v303_v48 = vmul.f32 %v301_v46, %v296_v47 }
 0x95d   :  { %305 = vrot.lane.b32.xlu0 %v303_v48, %s708_s20 }
 0x9cf   :  { %v306_v49 = vpop.permute.xlu0 %305 }
 0x9d0   :  { %v308_v50 = vadd.f32 %v634_v32, %v306_v49 }
 0x9d2   :  { %681 = vtanh.f32 %v308_v50 }
 0x9d8   :  { %v682_v51 = vpop.eup %681 }
 0x9d9   :  { %v310_v52 = vsub.f32 %v247_v28, %v682_v51 }
 0x9db   :  { %312 = vrot.lane.b32.xlu1 %v310_v52, %s710_s28 }
 0xa4d   :  { %v313_v53 = vpop.permute.xlu1 %312 }
 0xa4e   :  { %v315_v54 = vmul.f32 %v313_v53, %v296_v47  ;;  %v646_v53 = vld [vmem:[%s866_s0 + $0x30] sm:$0xff] }
 0xa50   :  { %317 = vrot.lane.b32.xlu2 %v315_v54, %s709_s23 }
 0xaaa   :  { %v318_v55 = vpop.permute.xlu2 %317 }
 0xaab   :  { %v320_v56 = vadd.f32 %v682_v51, %v318_v55 }
 0xaad   :  { %322 = vrot.lane.b32.xlu0 %v320_v56, %s708_s20 }
 0xb1f   :  { %v323_v57 = vpop.permute.xlu0 %322 }
 0xb20   :  { %637 = vst.msk [vmem:[%s867_s3 + $0x18] sm:$0xff] %vm18_vm0, %v323_v57  ;;  %639 = vmatmul.msk.f32.vlgmr.msrb.gmra.mxu0 %vm18_vm0, %v323_v57 }
 0xb9d   :  { %v348_v58 = vpop.f32.mrf.mxu0 }
 0xb9e   :  { %v371_v59 = vadd.f32 %v348_v58, %v749_v7  ;;  %v351_v61 = vadd.f32 %v638_v60, %v348_v58 }
 0xba0   :  { %373 = vrot.lane.b32.xlu1 %v371_v59, %s708_s20  ;;  %v640_v62 = vmul.f32 -1.442695, %v351_v61 }
 0xba2   :  { %683 = vpow2.f32 %v640_v62 }
 0xba8   :  { %v684_v63 = vpop.eup %683 }
 0xba9   :  { %v355_v0 = vadd.f32 1.0, %v684_v63 }
 0xbab   :  { %685 = vrcp.f32 %v355_v0  ;;  %v367_v6 = vand.u32 2147483648, %v355_v0  ;;  %vm361_vm3 = vweird.f32 %v355_v0  ;;  %v365_v8 = vand.u32 2147483647, %v355_v0 }
 0xbad   :  { %v368_v10 = vor.u32 1.1754944e-38, %v367_v6  ;;  %vm366_vm5 = vcmp.eq.f32.partialorder %v365_v8, 8.507059e+37 }
 0xbb1   :  { %v686_v1 = vpop.eup %685 }
 0xbb2   :  { %v357_v2 = vmul.f32 %v686_v1, %v355_v0  ;;  %vm362_vm2 = vweird.f32 %v686_v1 }
 0xbb3   :  { %vm363_vm4 = vmor %vm361_vm3, %vm362_vm2 }
 0xbb4   :  { %v358_v3 = vsub.f32 1.0, %v357_v2 }
 0xbb6   :  { %v359_v4 = vmul.f32 %v686_v1, %v358_v3 }
 0xbb8   :  { %v360_v5 = vadd.f32 %v686_v1, %v359_v4 }
 0xbba   :  { %v364_v9 = vsel %vm363_vm4, %v686_v1, %v360_v5 }
 0xbbb   :  { %v369_v12 = vsel %vm366_vm5, %v368_v10, %v364_v9 }
 0xc12   :  { %v374_v11 = vpop.permute.xlu1 %373 }
 0xc13   :  { %v376_v13 = vmul.f32 %v374_v11, %v369_v12 }
 0xc15   :  { %378 = vrot.lane.b32.xlu2 %v376_v13, %s708_s20 }
 0xc6f   :  { %v379_v14 = vpop.permute.xlu2 %378 }
 0xc70   :  { %v381_v15 = vadd.f32 %v638_v60, %v379_v14 }
 0xc72   :  { %687 = vtanh.f32 %v381_v15 }
 0xc78   :  { %v688_v16 = vpop.eup %687 }
 0xc79   :  { %v383_v17 = vsub.f32 %v320_v56, %v688_v16 }
 0xc7b   :  { %385 = vrot.lane.b32.xlu0 %v383_v17, %s710_s28 }
 0xced   :  { %v386_v18 = vpop.permute.xlu0 %385 }
 0xcee   :  { %v388_v19 = vmul.f32 %v386_v18, %v369_v12  ;;  %v650_v18 = vld [vmem:[%s866_s0 + $0x38] sm:$0xff] }
 0xcf0   :  { %390 = vrot.lane.b32.xlu1 %v388_v19, %s709_s23 }
 0xd62   :  { %v391_v20 = vpop.permute.xlu1 %390 }
 0xd63   :  { %v393_v21 = vadd.f32 %v688_v16, %v391_v20 }
 0xd65   :  { %395 = vrot.lane.b32.xlu2 %v393_v21, %s708_s20 }
 0xdbf   :  { %v396_v22 = vpop.permute.xlu2 %395 }
 0xdc0   :  { %641 = vst.msk [vmem:[%s867_s3 + $0x20] sm:$0xff] %vm18_vm0, %v396_v22  ;;  %643 = vmatmul.msk.f32.vlgmr.msrb.gmra.mxu1 %vm18_vm0, %v396_v22 }
 0xe3d   :  { %v421_v23 = vpop.f32.mrf.mxu1 }
 0xe3e   :  { %v444_v24 = vadd.f32 %v421_v23, %v749_v7  ;;  %v424_v26 = vadd.f32 %v642_v25, %v421_v23 }
 0xe40   :  { %446 = vrot.lane.b32.xlu0 %v444_v24, %s708_s20  ;;  %v644_v27 = vmul.f32 -1.442695, %v424_v26 }
 0xe42   :  { %689 = vpow2.f32 %v644_v27 }
 0xe48   :  { %v690_v28 = vpop.eup %689 }
 0xe49   :  { %v428_v29 = vadd.f32 1.0, %v690_v28 }
 0xe4b   :  { %691 = vrcp.f32 %v428_v29  ;;  %v440_v35 = vand.u32 2147483648, %v428_v29  ;;  %vm434_vm7 = vweird.f32 %v428_v29  ;;  %v438_v36 = vand.u32 2147483647, %v428_v29 }
 0xe4d   :  { %v441_v38 = vor.u32 1.1754944e-38, %v440_v35  ;;  %vm439_vm9 = vcmp.eq.f32.partialorder %v438_v36, 8.507059e+37 }
 0xe51   :  { %v692_v30 = vpop.eup %691 }
 0xe52   :  { %v430_v31 = vmul.f32 %v692_v30, %v428_v29  ;;  %vm435_vm6 = vweird.f32 %v692_v30 }
 0xe53   :  { %vm436_vm8 = vmor %vm434_vm7, %vm435_vm6 }
 0xe54   :  { %v431_v32 = vsub.f32 1.0, %v430_v31 }
 0xe56   :  { %v432_v33 = vmul.f32 %v692_v30, %v431_v32 }
 0xe58   :  { %v433_v34 = vadd.f32 %v692_v30, %v432_v33 }
 0xe5a   :  { %v437_v37 = vsel %vm436_vm8, %v692_v30, %v433_v34 }
 0xe5b   :  { %v442_v40 = vsel %vm439_vm9, %v441_v38, %v437_v37 }
 0xeb2   :  { %v447_v39 = vpop.permute.xlu0 %446 }
 0xeb3   :  { %v449_v41 = vmul.f32 %v447_v39, %v442_v40 }
 0xeb5   :  { %451 = vrot.lane.b32.xlu1 %v449_v41, %s708_s20 }
 0xf27   :  { %v452_v42 = vpop.permute.xlu1 %451 }
 0xf28   :  { %v454_v43 = vadd.f32 %v642_v25, %v452_v42 }
 0xf2a   :  { %693 = vtanh.f32 %v454_v43 }
 0xf30   :  { %v694_v44 = vpop.eup %693 }
 0xf31   :  { %v456_v45 = vsub.f32 %v393_v21, %v694_v44 }
 0xf33   :  { %458 = vrot.lane.b32.xlu2 %v456_v45, %s710_s28 }
 0xf8d   :  { %v459_v46 = vpop.permute.xlu2 %458 }
 0xf8e   :  { %v461_v47 = vmul.f32 %v459_v46, %v442_v40 }
 0xf90   :  { %463 = vrot.lane.b32.xlu0 %v461_v47, %s709_s23 }
0x1002   :  { %v464_v48 = vpop.permute.xlu0 %463 }
0x1003   :  { %v466_v49 = vadd.f32 %v694_v44, %v464_v48 }
0x1005   :  { %468 = vrot.lane.b32.xlu1 %v466_v49, %s708_s20 }
0x1077   :  { %v469_v50 = vpop.permute.xlu1 %468 }
0x1078   :  { %645 = vst.msk [vmem:[%s867_s3 + $0x28] sm:$0xff] %vm18_vm0, %v469_v50  ;;  %647 = vmatmul.msk.f32.vlgmr.msrb.gmra.mxu2 %vm18_vm0, %v469_v50 }
0x10fb   :  { %v494_v51 = vpop.f32.mrf.mxu2 }
0x10fc   :  { %v517_v52 = vadd.f32 %v494_v51, %v749_v7  ;;  %v497_v54 = vadd.f32 %v646_v53, %v494_v51 }
0x10fe   :  { %519 = vrot.lane.b32.xlu2 %v517_v52, %s708_s20  ;;  %v648_v55 = vmul.f32 -1.442695, %v497_v54 }
0x1100   :  { %695 = vpow2.f32 %v648_v55 }
0x1106   :  { %v696_v56 = vpop.eup %695 }
0x1107   :  { %v501_v57 = vadd.f32 1.0, %v696_v56 }
0x1109   :  { %697 = vrcp.f32 %v501_v57  ;;  %v513_v63 = vand.u32 2147483648, %v501_v57  ;;  %vm507_vm11 = vweird.f32 %v501_v57  ;;  %v511_v0 = vand.u32 2147483647, %v501_v57 }
0x110b   :  { %v514_v2 = vor.u32 1.1754944e-38, %v513_v63  ;;  %vm512_vm13 = vcmp.eq.f32.partialorder %v511_v0, 8.507059e+37 }
0x110f   :  { %v698_v58 = vpop.eup %697 }
0x1110   :  { %v503_v59 = vmul.f32 %v698_v58, %v501_v57  ;;  %vm508_vm10 = vweird.f32 %v698_v58 }
0x1111   :  { %vm509_vm12 = vmor %vm507_vm11, %vm508_vm10 }
0x1112   :  { %v504_v60 = vsub.f32 1.0, %v503_v59 }
0x1114   :  { %v505_v61 = vmul.f32 %v698_v58, %v504_v60 }
0x1116   :  { %v506_v62 = vadd.f32 %v698_v58, %v505_v61 }
0x1118   :  { %v510_v1 = vsel %vm509_vm12, %v698_v58, %v506_v62 }
0x1119   :  { %v515_v4 = vsel %vm512_vm13, %v514_v2, %v510_v1 }
0x1158   :  { %v520_v3 = vpop.permute.xlu2 %519 }
0x1159   :  { %v522_v5 = vmul.f32 %v520_v3, %v515_v4 }
0x115b   :  { %524 = vrot.lane.b32.xlu0 %v522_v5, %s708_s20 }
0x11cd   :  { %v525_v6 = vpop.permute.xlu0 %524 }
0x11ce   :  { %v527_v8 = vadd.f32 %v646_v53, %v525_v6 }
0x11d0   :  { %699 = vtanh.f32 %v527_v8 }
0x11d6   :  { %v700_v9 = vpop.eup %699 }
0x11d7   :  { %v529_v10 = vsub.f32 %v466_v49, %v700_v9 }
0x11d9   :  { %531 = vrot.lane.b32.xlu1 %v529_v10, %s710_s28 }
0x124b   :  { %v532_v11 = vpop.permute.xlu1 %531 }
0x124c   :  { %v534_v12 = vmul.f32 %v532_v11, %v515_v4 }
0x124e   :  { %536 = vrot.lane.b32.xlu2 %v534_v12, %s709_s23 }
0x12a8   :  { %v537_v13 = vpop.permute.xlu2 %536 }
0x12a9   :  { %v539_v14 = vadd.f32 %v700_v9, %v537_v13 }
0x12ab   :  { %541 = vrot.lane.b32.xlu0 %v539_v14, %s708_s20 }
0x131d   :  { %v542_v15 = vpop.permute.xlu0 %541 }
0x131e   :  { %649 = vst.msk [vmem:[%s867_s3 + $0x30] sm:$0xff] %vm18_vm0, %v542_v15  ;;  %651 = vmatmul.msk.f32.vlgmr.msrb.gmra.mxu3 %vm18_vm0, %v542_v15 }
0x13a1   :  { %v567_v16 = vpop.f32.mrf.mxu3 }
0x13a2   :  { %v590_v17 = vadd.f32 %v567_v16, %v749_v7  ;;  %v570_v19 = vadd.f32 %v650_v18, %v567_v16 }
0x13a4   :  { %592 = vrot.lane.b32.xlu1 %v590_v17, %s708_s20  ;;  %v652_v20 = vmul.f32 -1.442695, %v570_v19 }
0x13a6   :  { %701 = vpow2.f32 %v652_v20 }
0x13ac   :  { %v702_v21 = vpop.eup %701 }
0x13ad   :  { %v574_v22 = vadd.f32 1.0, %v702_v21 }
0x13af   :  { %703 = vrcp.f32 %v574_v22  ;;  %v586_v28 = vand.u32 2147483648, %v574_v22  ;;  %vm580_vm15 = vweird.f32 %v574_v22  ;;  %v584_v7 = vand.u32 2147483647, %v574_v22 }
0x13b1   :  { %v587_v30 = vor.u32 1.1754944e-38, %v586_v28  ;;  %vm585_vm2 = vcmp.eq.f32.partialorder %v584_v7, 8.507059e+37 }
0x13b5   :  { %v704_v23 = vpop.eup %703 }
0x13b6   :  { %v576_v24 = vmul.f32 %v704_v23, %v574_v22  ;;  %vm581_vm14 = vweird.f32 %v704_v23 }
0x13b7   :  { %vm582_vm1 = vmor %vm580_vm15, %vm581_vm14 }
0x13b8   :  { %v577_v25 = vsub.f32 1.0, %v576_v24 }
0x13ba   :  { %v578_v26 = vmul.f32 %v704_v23, %v577_v25 }
0x13bc   :  { %v579_v27 = vadd.f32 %v704_v23, %v578_v26 }
0x13be   :  { %v583_v29 = vsel %vm582_vm1, %v704_v23, %v579_v27 }
0x13bf   :  { %v588_v32 = vsel %vm585_vm2, %v587_v30, %v583_v29 }
0x1416   :  { %v593_v31 = vpop.permute.xlu1 %592 }
0x1417   :  { %v595_v33 = vmul.f32 %v593_v31, %v588_v32 }
0x1419   :  { %597 = vrot.lane.b32.xlu2 %v595_v33, %s708_s20 }
0x1473   :  { %v598_v34 = vpop.permute.xlu2 %597 }
0x1474   :  { %v600_v35 = vadd.f32 %v650_v18, %v598_v34 }
0x1476   :  { %705 = vtanh.f32 %v600_v35 }
0x147c   :  { %v706_v36 = vpop.eup %705 }
0x147d   :  { %v602_v37 = vsub.f32 %v539_v14, %v706_v36 }
0x147f   :  { %604 = vrot.lane.b32.xlu0 %v602_v37, %s710_s28 }
0x14f1   :  { %v605_v38 = vpop.permute.xlu0 %604 }
0x14f2   :  { %v607_v39 = vmul.f32 %v605_v38, %v588_v32 }
0x14f4   :  { %609 = vrot.lane.b32.xlu1 %v607_v39, %s709_s23 }
0x1566   :  { %v610_v40 = vpop.permute.xlu1 %609 }
0x1567   :  { %v612_v41 = vadd.f32 %v706_v36, %v610_v40 }
0x1569   :  { %614 = vrot.lane.b32.xlu2 %v612_v41, %s708_s20 }
0x15c3   :  { %v615_v42 = vpop.permute.xlu2 %614 }
0x15c4   :  { %653 = vst.msk [vmem:[%s867_s3 + $0x38] sm:$0xff] %vm18_vm0, %v615_v42 }
0x15c5   :  { %619 = vst.msk [vmem:[#allocation2] sm:$0xff] %vm18_vm0, %v615_v42 }

</bundles_post_ra>
